<compile_context>
chip_gen: v6e
topology: v6e:2x2x1
jax: 0.10.0
libtpu: 0.0.40
codegen_flags: <defaults>
</compile_context>

<pallas_src>
import jax
import jax.numpy as jnp
from jax.experimental import pallas as pl
from jax.experimental.pallas import tpu as pltpu


_LANE = 128
_SUBLANE = {4: 8, 2: 16, 1: 32}   # itemsize -> sublane multiple (f32 / bf16 / int8-fp8)
_MIN_PALLAS_C = 8                 # below this, XLA's transpose wins (review fallback)
_MIB = 1024 * 1024


def _round_up(x, m):
    return (x + m - 1) // m * m


def _vmem_capacity_bytes():
    try:
        return int(pltpu.get_tpu_info().vmem_capacity_bytes)
    except Exception:
        return 64 * _MIB          # conservative default (v7x-sized)


def _gen_params():
    """Generation-aware budgets: (channel-tile cap, tile-pair budget, vmem limit)."""
    vmem = _vmem_capacity_bytes()
    if vmem <= 64 * _MIB:         # v7x-class: 64 MiB physical VMEM per TensorCore
        return 256, 8 * _MIB, 40 * _MIB
    return 512, 20 * _MIB, 80 * _MIB   # v5e / v6e: 128 MiB VMEM


def _choose_tiles(C, HW, itemsize, c_cap, pair_budget):
    """Pick (t_c, t_hw) satisfying the (sublane, 128)-or-full-extent layout rule."""
    sub = _SUBLANE.get(itemsize, 8)

    # Channel tile: lane dim of the output block.
    if C % _LANE == 0:
        t_c = min(c_cap, C)
        while C % t_c:
            t_c -= _LANE          # a 128-multiple that divides C (no edge block)
    elif C > 2 * c_cap:
        t_c = c_cap               # 128-multiple tile + masked edge block (bounds VMEM)
    else:
        t_c = C                   # full extent: always layout-legal

    # Spatial (H*W) tile: lane dim of the input block / sublane dim of the
    # output block -> multiple of 128 or full extent, sized so one (in + out)
    # block pair stays under the generation-specific budget (double-buffered).
    def pair_bytes(t):
        in_b = _round_up(t_c, sub) * _round_up(t, _LANE) * itemsize
        out_b = _round_up(t, sub) * _round_up(t_c, _LANE) * itemsize
        return in_b + out_b

    t_hw = min(_round_up(HW, _LANE), 8192)
    while t_hw > _LANE and pair_bytes(t_hw) > pair_budget:
        t_hw -= _LANE
    if t_hw >= HW:
        t_hw = HW                 # single full block along H*W (always legal)
    return t_c, t_hw, pair_bytes(t_hw)


def _transpose_tile_kernel(x_ref, o_ref):
    # x_ref: (t_c, t_hw) -> o_ref: (t_hw, t_c) — plain 2-D tile transpose (XLU).
    # TODO(synk): for bf16/int8, pack 2/4 lane-neighbours into u32 via
    # pltpu.bitcast before the transpose and unpack after, halving/quartering
    # XLU relayout work where HBM is no longer the bottleneck (v7x).
    o_ref[...] = x_ref[...].T


def _make_in_spec(block_shape, index_map, n_buffers):
    if n_buffers is not None:
        try:
            return pl.BlockSpec(block_shape, index_map,
                                pipeline_mode=pl.Buffered(n_buffers))
        except TypeError:         # BlockSpec without pipeline_mode support
            pass
    return pl.BlockSpec(block_shape, index_map)


def to_channels_last(x):
    """x: (N, C, H, W) -> (N, H, W, C); pure layout permute, same dtype/values."""
    N, C, H, W = x.shape
    HW = H * W

    # Tiny channel counts (C=3/4 image tensors): every Pallas output store would
    # be masked to C lanes and every HBM write run only C*itemsize bytes, so the
    # kernel cannot beat XLA's native transpose — dispatch there (per review).
    # TODO(synk): lane-dense interleaved (H*W*C)-wide output tile for
    # 8 <= C < 128 once Mosaic lowers the in-kernel (t_hw, C) -> (t_hw*C,)
    # relayout reliably (pltpu.einshape 'ct->(tc)').
    if C < _MIN_PALLAS_C:
        return jnp.transpose(x, (0, 2, 3, 1))

    itemsize = jnp.dtype(x.dtype).itemsize
    c_cap, pair_budget, vmem_limit = _gen_params()
    t_c, t_hw, pair = _choose_tiles(C, HW, itemsize, c_cap, pair_budget)
    n_hw = pl.cdiv(HW, t_hw)
    n_c = pl.cdiv(C, t_c)

    squeezed = pl.Squeezed() if hasattr(pl, "Squeezed") else None

    # Triple-buffer the input for small tiles on long grids (hides DMA issue /
    # writeback jitter at v7x HBM bandwidth); costs one extra tile of VMEM.
    n_buffers = 3 if (pair <= 4 * _MIB and N * n_hw * n_c >= 3) else None

    x3 = x.reshape(N, C, HW)      # free, contiguity-preserving view

    out3 = pl.pallas_call(
        _transpose_tile_kernel,
        out_shape=jax.ShapeDtypeStruct((N, HW, C), x.dtype),
        # Largest parallel extent (usually the H*W-tile axis) leads so v7x
        # megacore sharding stays balanced even when N == 1 or odd.
        grid=(n_hw, N, n_c),
        in_specs=[
            _make_in_spec((squeezed, t_c, t_hw),
                          lambda i, n, j: (n, j, i), n_buffers),
        ],
        out_specs=pl.BlockSpec((squeezed, t_hw, t_c), lambda i, n, j: (n, i, j)),
        compiler_params=pltpu.CompilerParams(
            # All grid axes are independent -> let megacore shard any of them.
            dimension_semantics=("parallel", "parallel", "parallel"),
            vmem_limit_bytes=vmem_limit,
        ),
        cost_estimate=pl.CostEstimate(
            flops=0,
            transcendentals=0,
            bytes_accessed=2 * N * C * HW * itemsize,
        ),
    )(x3)

    return out3.reshape(N, H, W, C)  # free, contiguity-preserving view


if __name__ == "__main__":
    key = jax.random.PRNGKey(0)
    k1, k2, k3 = jax.random.split(key, 3)

    # Primary check: conv-style activation with tiny C (C=4 -> XLA fallback path).
    x = jax.random.normal(k1, (2, 4, 16, 16), dtype=jnp.float32)  # NCHW
    out = jax.block_until_ready(to_channels_last(x))
    ref = jnp.transpose(x, (0, 2, 3, 1))
    assert out.shape == (2, 16, 16, 4), out.shape
    assert out.dtype == x.dtype
    assert jnp.array_equal(out, ref), "mismatch vs reference permute (C=4)"

    # Pallas kernel path, moderate C (full-extent channel block, 8 <= C < 128).
    x2 = jax.random.normal(k2, (2, 32, 16, 16), dtype=jnp.float32)
    out2 = jax.block_until_ready(to_channels_last(x2))
    ref2 = jnp.transpose(x2, (0, 2, 3, 1))
    assert out2.shape == (2, 16, 16, 32), out2.shape
    assert jnp.array_equal(out2, ref2), "mismatch vs reference permute (C=32)"

    # Pallas kernel path, lane-dense output tiles (C % 128 == 0).
    x3 = jax.random.normal(k3, (1, 128, 16, 16), dtype=jnp.float32)
    out3 = jax.block_until_ready(to_channels_last(x3))
    ref3 = jnp.transpose(x3, (0, 2, 3, 1))
    assert out3.shape == (1, 16, 16, 128), out3.shape
    assert jnp.array_equal(out3, ref3), "mismatch vs reference permute (C=128)"

    print("KERNEL_OK")
</pallas_src>

<mosaic_0001>
module attributes {stable_mosaic.version = 11 : i64} {
  func.func @_transpose_tile_kernel(%arg0: i32, %arg1: i32, %arg2: i32, %arg3: memref<1x32x256xf32, #tpu.memory_space<vmem>>, %arg4: memref<1x256x32xf32, #tpu.memory_space<vmem>>) attributes {dimension_semantics = [#tpu.dimension_semantics<parallel>, #tpu.dimension_semantics<parallel>, #tpu.dimension_semantics<parallel>], iteration_bounds = array<i64: 1, 2, 1>, scalar_prefetch = 0 : i64, scratch_operands = 0 : i64, tpu.core_type = #tpu.core_type<tc>, window_params = [{transform_indices = @transform_0, window_bounds = array<i64: 1, 32, 256>}, {transform_indices = @transform_1, window_bounds = array<i64: 1, 256, 32>}]} {
    %c0 = arith.constant 0 : index
    %c0_0 = arith.constant 0 : index
    %c0_1 = arith.constant 0 : index
    %0 = vector.load %arg3[%c0, %c0_0, %c0_1] : memref<1x32x256xf32, #tpu.memory_space<vmem>>, vector<1x32x256xf32>
    %1 = vector.shape_cast %0 : vector<1x32x256xf32> to vector<32x256xf32>
    %2 = tpu.transpose %1, [1, 0] : vector<32x256xf32> -> vector<256x32xf32>
    %c0_2 = arith.constant 0 : index
    %c0_3 = arith.constant 0 : index
    %c0_4 = arith.constant 0 : index
    %3 = vector.load %arg4[%c0_2, %c0_3, %c0_4] : memref<1x256x32xf32, #tpu.memory_space<vmem>>, vector<1x256x32xf32>
    %4 = vector.shape_cast %3 : vector<1x256x32xf32> to vector<256x32xf32>
    %5 = vector.shape_cast %2 : vector<256x32xf32> to vector<1x256x32xf32>
    tpu.vector_store %arg4[%c0_2, %c0_3, %c0_4], %5 {strides = array<i32>} : memref<1x256x32xf32, #tpu.memory_space<vmem>>, vector<1x256x32xf32>,
    return
  }
  func.func @transform_0(%arg0: i32, %arg1: i32, %arg2: i32) -> (i32, i32, i32) {
    %c0_i32 = arith.constant 0 : i32
    return %arg1, %arg2, %arg0 : i32, i32, i32
  }
  func.func @transform_1(%arg0: i32, %arg1: i32, %arg2: i32) -> (i32, i32, i32) {
    %c0_i32 = arith.constant 0 : i32
    return %arg1, %arg0, %arg2 : i32, i32, i32
  }
}

</mosaic_0001>

<bundles_post_ra>
// kernel: tpu_custom_call.1
= control target key start
LH: loop header
LB: loop body
LE: loop exit
PB: predicated region body
PF: predicated region fallthrough
CT: control target
= control target key end

     0   :  { %6 = vsyncpa [#allocation3], 0  ;;  %s729_s0 = inlined_call_operand.hbm [shape: f32[2,32,256], index: 0, kind: input, shape index: {}]   ;;  %s730_s1 = inlined_call_operand.vmem [shape: f32[2,256,32], index: 1, kind: output, shape index: {}]  }
   0x1   :  { %8 = vsyncpa [#allocation3 + $0x1], 0  ;;  %s567_s6 = smov 0   ;;  %s569_s7 = smov 0  }
   0x2   :  { %s571_s8 = smov 0   ;;  %s573_s9 = smov 0  }
   0x3   :  { %s575_s10 = smov 0   ;;  %s577_s11 = smov 0  }
   0x4 LB: > { %s401_s12 = sadd.s32 4294967295, %s552_s11   ;;  %s29_s13 = sadd.s32 1, %s548_s10  ;;  %s552_s11 = sphi %s577_s11, %s14_s11   ;;  %s548_s10 = sphi %s575_s10, %s738_s10   ;;  %s544_s9 = sphi %s573_s9, %s737_s9   ;;  %s540_s8 = sphi %s571_s8, %s736_s8   ;;  %s536_s7 = sphi %s569_s7, %s735_s7   ;;  %s532_s6 = sphi %s567_s6, %s734_s6  }
   0x5   : > { %p31_p0 = scmp.ge.s32.totalorder %s29_s13, 2  ;;  %s44_s14 = sadd.s32 1, %s540_s8 }
   0x6   : > { %p51_p1 = scmp.ne.s32.totalorder %s540_s8, %s536_s7  ;;  %p52_p2 = scmp.eq.s32.totalorder %s552_s11, 0 }
   0x7   : > { %s740_s13 = smov (%p31_p0, %s29_s13), 0  ;;  %p57_p4 = scmp.ne.s32.totalorder %s536_s7, %s532_s6 }
   0x8   : > { %p603_p3 = por %p52_p2, %p51_p1  ;;  %s37_s16 = ssub.s32 %s548_s10, %s740_s13 }
   0x9   : > { %p58_p5 = scmp.eq.s32.totalorder %s401_s12, 0  ;;  %p42_p6 = scmp.eq.s32.totalorder %s37_s16, 0 }
   0xa   : > { %p422_p8 = scmp.lt.s32.totalorder %s552_s11, 2  ;;  %s111_s19 = sand.u32 1, %s540_s8  }
   0xb   : > { %p610_p7 = por %p58_p5, %p57_p4  ;;  %s414_s20 = sshll.u32 %s548_s10, 10 }
   0xc   : > { %s616_s18 = scalar_select %p42_p6, %s540_s8, %s44_s14  }
   0xd   : > { %s405_s21 = sshll.u32 %s111_s19, 6  ;;  %s126_s24 = scalar_lea.hbm %s729_s0, %s414_s20 }
   0xe   : > { %s115_s25 = scalar_lea.vmem [#allocation2], %s405_s21  ;;  %p625_p9 = pnand %p422_p8, %p603_p3 }
   0xf   : > { %s127_s26 = sshll.u32 %s115_s25, 4  ;;  %s112_s28 = scalar_lea.sflag [#allocation3], %s111_s19  ;;  %s128_s26 = int_to_ptr.vmem [resolvable:$true] %s127_s26 }
  0x10   : > { %p476_p10 = pneg %p625_p9  ;;  %s487_s29 = scalar_lea.vmem %s128_s26, 1024 }
  0x11   : > { %p488_p11 = scmp.ne.s32.totalorder %s128_s26, %s487_s29  ;;  %s554_s30 = smov [#allocation2]  }
  0x12   : > { %s492_s2 = sshll.u32 %s554_s30, 4  ;;  %s493_s2 = int_to_ptr.vmem [resolvable:$false] %s492_s2 }
  0x13   : > { %p490_p12 = pnand %p488_p11, %p476_p10  ;;  %s494_s3 = scalar_lea.vmem %s493_s2, 2048 }
  0x14   : > { %p495_p0 = scmp.lt.s32.totalorder %s128_s26, %s493_s2  ;;  %p496_p1 = scmp.lt.s32.totalorder %s494_s3, %s487_s29 }
  0x15   : > { %p491_p13 = pneg %p490_p12 }
  0x16   : > { %p497_p2 = por %p496_p1, %p495_p0 }
  0x18   : > { %p498_p3 = pnand %p497_p2, %p491_p13 }
  0x1a   : > { %501 = shalt.err (!%p498_p3)
}
  0x1b   : > { %s555_s4 = smov 256   ;;  %s556_s5 = smov 16  }
  0x1c   : > { %421 = dma.hbm_to_vmem [thread:$0]  (!%p625_p9), %s126_s24, 1024, %s128_s26, %s112_s28, %s555_s4, %s555_s4, %s556_s5  }
  0x1d   : > { %p408_p4 = scmp.ge.s32.totalorder %s552_s11, 1  ;;  %p135_p5 = scmp.lt.s32.totalorder %s552_s11, 3 }
  0x1f   : > { %p136_p6 = pnand %p408_p4, %p135_p5 }
  0x20   : > { %s141_s6 = sand.u32 (!%p136_p6), 1, %s536_s7  }
  0x21   : > { %139 = sbr.rel (%p136_p6) target bundleno = 226 (0xe2), region = 24  ;;  %s409_s12 = sshll.u32 (!%p136_p6), %s141_s6, 6 }
  0x22   : > { %s142_s14 = scalar_lea.sflag (!%p136_p6), [#allocation3], %s141_s6  ;;  %s145_s15 = scalar_lea.vmem (!%p136_p6), [#allocation2], %s409_s12 }
  0x26   : > { %527 = dma.done.wait (%p610_p7), %s142_s14, 1024  }
  0x27   : > { %529 = vsyncadd (%p610_p7), %s142_s14, 4294966272  ;;  %v187_v0 = vld [vmem:[%s145_s15 + $0x8] sm:$0xff]  ;;  %v186_v1 = vld [vmem:[%s145_s15] sm:$0xff]  ;;  %p174_p8 = scmp.lt.s32.totalorder %s544_s9, 1  ;;  %vm258_vm0 = vcmask 261120  }
  0x28   : > { %226 = vxpose.xlu1.b32.start [1/4] (short) %v187_v0, 128  ;;  %194 = vxpose.xlu0.b32.start [1/4] (short) %v186_v1, 128  ;;  %v189_v2 = vld [vmem:[%s145_s15 + $0x18] sm:$0xff]  ;;  %v188_v3 = vld [vmem:[%s145_s15 + $0x10] sm:$0xff]  ;;  %v191_v4 = vld [vmem:[%s145_s15 + $0x28] sm:$0xff] }
  0x29   : > { %v190_v5 = vld [vmem:[%s145_s15 + $0x20] sm:$0xff]  ;;  %v193_v6 = vld [vmem:[%s145_s15 + $0x38] sm:$0xff]  ;;  %v192_v7 = vld [vmem:[%s145_s15 + $0x30] sm:$0xff]  ;;  %s742_s9 = smov (!%p174_p8, %s544_s9), 1 }
  0x2a   : > { %s415_s16 = sshll.u32 %s742_s9, 8 }
  0x2b   : > { %s645_s20 = scalar_lea.vmem %s730_s1, %s415_s16 }
  0x2c   : > { %227 = vxpose.xlu1.b32.cont [2/4] (short) %v189_v2, 128  ;;  %195 = vxpose.xlu0.b32.cont [2/4] (short) %v188_v3, 128 }
  0x30   : > { %228 = vxpose.xlu1.b32.cont [3/4] (short) %v191_v4, 128  ;;  %196 = vxpose.xlu0.b32.cont [3/4] (short) %v190_v5, 128 }
  0x34   : > { %229 = vxpose.xlu1.b32.end [4/4] (short) %v193_v6, 128  ;;  %197 = vxpose.xlu0.b32.end [4/4] (short) %v192_v7, 128 }
  0xa4   : > { %v242_v8 = vpop.trf.xlu1  ;;  %v210_v9 = vpop.trf.xlu0 }
  0xa5   : > { %275 = vst.msk [vmem:[%s645_s20 + $0x80] sm:$0xff] %vm258_vm0, %v242_v8  ;;  %259 = vst.msk [vmem:[%s645_s20] sm:$0xff] %vm258_vm0, %v210_v9 }
  0xa8   : > { %v243_v10 = vpop.trf.xlu1  ;;  %v211_v11 = vpop.trf.xlu0 }
  0xa9   : > { %276 = vst.msk [vmem:[%s645_s20 + $0x88] sm:$0xff] %vm258_vm0, %v243_v10  ;;  %260 = vst.msk [vmem:[%s645_s20 + $0x8] sm:$0xff] %vm258_vm0, %v211_v11 }
  0xac   : > { %v244_v12 = vpop.trf.xlu1  ;;  %v212_v13 = vpop.trf.xlu0 }
  0xad   : > { %277 = vst.msk [vmem:[%s645_s20 + $0x90] sm:$0xff] %vm258_vm0, %v244_v12  ;;  %261 = vst.msk [vmem:[%s645_s20 + $0x10] sm:$0xff] %vm258_vm0, %v212_v13 }
  0xb0   : > { %v245_v14 = vpop.trf.xlu1  ;;  %v213_v15 = vpop.trf.xlu0 }
  0xb1   : > { %278 = vst.msk [vmem:[%s645_s20 + $0x98] sm:$0xff] %vm258_vm0, %v245_v14  ;;  %262 = vst.msk [vmem:[%s645_s20 + $0x18] sm:$0xff] %vm258_vm0, %v213_v15 }
  0xb4   : > { %v246_v16 = vpop.trf.xlu1  ;;  %v214_v17 = vpop.trf.xlu0 }
  0xb5   : > { %279 = vst.msk [vmem:[%s645_s20 + $0xa0] sm:$0xff] %vm258_vm0, %v246_v16  ;;  %263 = vst.msk [vmem:[%s645_s20 + $0x20] sm:$0xff] %vm258_vm0, %v214_v17 }
  0xb8   : > { %v247_v18 = vpop.trf.xlu1  ;;  %v215_v19 = vpop.trf.xlu0 }
  0xb9   : > { %280 = vst.msk [vmem:[%s645_s20 + $0xa8] sm:$0xff] %vm258_vm0, %v247_v18  ;;  %264 = vst.msk [vmem:[%s645_s20 + $0x28] sm:$0xff] %vm258_vm0, %v215_v19 }
  0xbc   : > { %v248_v20 = vpop.trf.xlu1  ;;  %v216_v21 = vpop.trf.xlu0 }
  0xbd   : > { %281 = vst.msk [vmem:[%s645_s20 + $0xb0] sm:$0xff] %vm258_vm0, %v248_v20  ;;  %265 = vst.msk [vmem:[%s645_s20 + $0x30] sm:$0xff] %vm258_vm0, %v216_v21 }
  0xc0   : > { %v249_v22 = vpop.trf.xlu1  ;;  %v217_v23 = vpop.trf.xlu0 }
  0xc1   : > { %282 = vst.msk [vmem:[%s645_s20 + $0xb8] sm:$0xff] %vm258_vm0, %v249_v22  ;;  %266 = vst.msk [vmem:[%s645_s20 + $0x38] sm:$0xff] %vm258_vm0, %v217_v23 }
  0xc4   : > { %v250_v24 = vpop.trf.xlu1  ;;  %v218_v25 = vpop.trf.xlu0 }
  0xc5   : > { %283 = vst.msk [vmem:[%s645_s20 + $0xc0] sm:$0xff] %vm258_vm0, %v250_v24  ;;  %267 = vst.msk [vmem:[%s645_s20 + $0x40] sm:$0xff] %vm258_vm0, %v218_v25 }
  0xc8   : > { %v251_v26 = vpop.trf.xlu1  ;;  %v219_v27 = vpop.trf.xlu0 }
  0xc9   : > { %284 = vst.msk [vmem:[%s645_s20 + $0xc8] sm:$0xff] %vm258_vm0, %v251_v26  ;;  %268 = vst.msk [vmem:[%s645_s20 + $0x48] sm:$0xff] %vm258_vm0, %v219_v27 }
  0xcc   : > { %v252_v28 = vpop.trf.xlu1  ;;  %v220_v29 = vpop.trf.xlu0 }
  0xcd   : > { %285 = vst.msk [vmem:[%s645_s20 + $0xd0] sm:$0xff] %vm258_vm0, %v252_v28  ;;  %269 = vst.msk [vmem:[%s645_s20 + $0x50] sm:$0xff] %vm258_vm0, %v220_v29 }
  0xd0   : > { %v253_v30 = vpop.trf.xlu1  ;;  %v221_v31 = vpop.trf.xlu0 }
  0xd1   : > { %286 = vst.msk [vmem:[%s645_s20 + $0xd8] sm:$0xff] %vm258_vm0, %v253_v30  ;;  %270 = vst.msk [vmem:[%s645_s20 + $0x58] sm:$0xff] %vm258_vm0, %v221_v31 }
  0xd4   : > { %v254_v32 = vpop.trf.xlu1  ;;  %v222_v33 = vpop.trf.xlu0 }
  0xd5   : > { %287 = vst.msk [vmem:[%s645_s20 + $0xe0] sm:$0xff] %vm258_vm0, %v254_v32  ;;  %271 = vst.msk [vmem:[%s645_s20 + $0x60] sm:$0xff] %vm258_vm0, %v222_v33 }
  0xd8   : > { %v255_v34 = vpop.trf.xlu1  ;;  %v223_v35 = vpop.trf.xlu0 }
  0xd9   : > { %288 = vst.msk [vmem:[%s645_s20 + $0xe8] sm:$0xff] %vm258_vm0, %v255_v34  ;;  %272 = vst.msk [vmem:[%s645_s20 + $0x68] sm:$0xff] %vm258_vm0, %v223_v35 }
  0xdc   : > { %v256_v36 = vpop.trf.xlu1  ;;  %v224_v37 = vpop.trf.xlu0 }
  0xdd   : > { %289 = vst.msk [vmem:[%s645_s20 + $0xf0] sm:$0xff] %vm258_vm0, %v256_v36  ;;  %273 = vst.msk [vmem:[%s645_s20 + $0x70] sm:$0xff] %vm258_vm0, %v224_v37 }
  0xe0   : > { %v257_v38 = vpop.trf.xlu1  ;;  %v225_v39 = vpop.trf.xlu0 }
  0xe1   : > { %290 = vst.msk [vmem:[%s645_s20 + $0xf8] sm:$0xff] %vm258_vm0, %v257_v38  ;;  %274 = vst.msk [vmem:[%s645_s20 + $0x78] sm:$0xff] %vm258_vm0, %v225_v39 }
  0xe2 PF: > { %s14_s11 = sadd.s32 1, %s552_s11   ;;  %s734_s6 = smov %s536_s7 }
  0xe3   : > { %p11_p7 = scmp.ge.s32.totalorder %s14_s11, 4   ;;  %s735_s7 = smov %s540_s8 }
  0xe4   : > { %s736_s8 = smov %s616_s18  ;;  %s737_s9 = smov %s548_s10 }
  0xe5   : > { %s738_s10 = smov %s740_s13  ;;  %13 = sbr.rel (!%p11_p7) target bundleno = 4 (0x4), region = 64 }
  0xea   :  { %327 = vsyncpa [#allocation3], 1 }
  0xeb   :  { %329 = vsyncpa [#allocation3 + $0x1], 1 }

</bundles_post_ra>
